<compile_context>
chip_gen: v7x
topology: tpu7x:2x2x1
jax: 0.10.0
libtpu: 0.0.40
codegen_flags: <defaults>
</compile_context>

<pallas_src>
from functools import partial

import jax
import jax.numpy as jnp
from jax.experimental import pallas as pl
from jax.experimental.pallas import tpu as pltpu


def _round_up(x: int, m: int) -> int:
    return ((x + m - 1) // m) * m


def _seg_mean_kernel(start_ref, end_ref, scale_ref, feats_ref, out_ref, acc_ref,
                     *, n_rem: int):
    # grid = (d_tiles, n_tiles); d is "parallel", n is the reduction axis.
    n = pl.program_id(1)
    n_tiles = pl.num_programs(1)

    @pl.when(n == 0)
    def _():
        acc_ref[...] = jnp.zeros_like(acc_ref)

    tile_n = feats_ref.shape[0]
    num_graphs = start_ref.shape[0]

    x = feats_ref[...]
    if n_rem:
        # The last node tile is partial: its trailing rows hold unspecified
        # (possibly NaN/Inf) data.  0 * NaN = NaN would contaminate the
        # accumulator even with zero membership, so zero them explicitly.
        limit = jnp.where(n == n_tiles - 1, n_rem, tile_n)
        row_iota = jax.lax.broadcasted_iota(jnp.int32, (tile_n, 1), 0)
        x = jnp.where(row_iota < limit, x, jnp.zeros_like(x))

    # Loop-invariant lane iota; fold the tile's global row offset into the
    # scalar (B, 1) bounds instead (hoistable out of the grid loop).
    lane = jax.lax.broadcasted_iota(jnp.int32, (num_graphs, tile_n), 1)
    row0 = n * tile_n
    lo = start_ref[...] - row0          # (B, 1)
    hi = end_ref[...] - row0            # (B, 1)
    member = (lane >= lo) & (lane < hi)  # (B, TILE_N)

    # Pure 0/1 membership -> segment sum is an MXU matmul with f32 accumulation.
    s = member.astype(x.dtype)
    acc_ref[...] += jnp.dot(s, x, preferred_element_type=jnp.float32)

    @pl.when(n == n_tiles - 1)
    def _():
        # Apply 1/count once, in f32, then cast to the output dtype.
        out_ref[...] = (acc_ref[...] * scale_ref[...]).astype(out_ref.dtype)


def global_average_block(feats, offsets, counts, *, tile_n=1024, tile_d=1024):
    """Pallas segment-mean readout (DGL AvgPooling / GlobalAverageBlock forward).

    feats:   [N, D] float node features (node-major, concatenated graphs)
    offsets: [B] int32 start index of each graph's nodes
    counts:  [B] int32 number of nodes per graph
    returns: [B, D] per-graph mean features (same dtype as feats)
    """
    N, D = feats.shape
    B = counts.shape[0]
    itemsize = jnp.dtype(feats.dtype).itemsize

    # ---- node-tile size: multiple of 8, or the full extent when N is small ----
    tile_n = max(8, _round_up(int(tile_n), 8))
    if N <= tile_n:
        tile_n = N                      # full-extent block bypasses the 8-rule
    n_tiles = pl.cdiv(N, tile_n)
    n_rem = N % tile_n                  # static; 0 when tiles divide N exactly

    # ---- feature-tile size: multiple of 128 (partial edge block allowed) or
    #      the full extent when D < 128.  Keep d_tiles >= 2 when D >= 256 so
    #      the "parallel" axis can shard across both TensorCores on v7x. ----
    if D < 128:
        tile_d = D
    else:
        max_td = (D // 128) * 128
        tile_d = min(_round_up(int(tile_d), 128), max_td)
        if D >= 256:
            tile_d = min(tile_d, _round_up((D + 1) // 2, 128))
    d_tiles = pl.cdiv(D, tile_d)

    starts = offsets.astype(jnp.int32).reshape(B, 1)
    ends = (offsets.astype(jnp.int32) + counts.astype(jnp.int32)).reshape(B, 1)
    # Guard empty graphs: clamp the divisor so an empty graph yields a zero
    # row instead of NaN/Inf.  Scale stays in f32 (applied in the epilogue).
    scale = (1.0 / jnp.maximum(counts, 1).astype(jnp.float32)).reshape(B, 1)

    # ---- VMEM budget: double-buffered feats tile + out block + f32 acc ----
    vmem_need = (2 * tile_n * tile_d * itemsize        # feats double-buffer
                 + 2 * B * tile_d * itemsize           # out double-buffer
                 + B * tile_d * 4                      # f32 accumulator scratch
                 + 6 * _round_up(B, 8) * 128 * 4)      # tiny (B,1) operands
    vmem_limit = min(max(int(vmem_need * 1.4) + (2 << 20), 16 << 20), 64 << 20)

    cost = pl.CostEstimate(
        flops=2 * B * N * D,
        transcendentals=0,
        bytes_accessed=(N * D + B * D) * itemsize + 3 * B * 4,
    )

    out = pl.pallas_call(
        partial(_seg_mean_kernel, n_rem=n_rem),
        out_shape=jax.ShapeDtypeStruct((B, D), feats.dtype),
        grid_spec=pltpu.PrefetchScalarGridSpec(
            num_scalar_prefetch=0,
            grid=(d_tiles, n_tiles),
            in_specs=[
                pl.BlockSpec((B, 1), lambda d, n: (0, 0)),              # starts
                pl.BlockSpec((B, 1), lambda d, n: (0, 0)),              # ends
                pl.BlockSpec((B, 1), lambda d, n: (0, 0)),              # 1/count (f32)
                pl.BlockSpec((tile_n, tile_d), lambda d, n: (n, d)),    # feats tile
            ],
            out_specs=pl.BlockSpec((B, tile_d), lambda d, n: (0, d)),
            scratch_shapes=[pltpu.VMEM((B, tile_d), jnp.float32)],
        ),
        compiler_params=pltpu.CompilerParams(
            dimension_semantics=("parallel", "arbitrary"),
            vmem_limit_bytes=vmem_limit,
        ),
        cost_estimate=cost,
    )(starts, ends, scale, feats)

    return out


if __name__ == "__main__":
    key = jax.random.PRNGKey(0)

    # ---- Check 1: small batched graph (2 graphs, 5 + 7 nodes, D = 32) ----
    node_counts = jnp.array([5, 7], dtype=jnp.int32)
    offsets = jnp.array([0, 5], dtype=jnp.int32)
    N, D = int(node_counts.sum()), 32
    feats = jax.random.normal(key, (N, D), dtype=jnp.float32)

    out = jax.block_until_ready(global_average_block(feats, offsets, node_counts))
    ref = jnp.stack([feats[0:5].mean(axis=0), feats[5:12].mean(axis=0)])
    assert out.shape == (2, D)
    assert jnp.allclose(out, ref, atol=1e-5, rtol=1e-5)

    # ---- Check 2: exercises the partial-node-tile mask, multi-tile reduction
    #      and 2 feature tiles (3 graphs, 4+9+7 = 20 nodes, D = 256, tile_n=8) ----
    counts2 = jnp.array([4, 9, 7], dtype=jnp.int32)
    offsets2 = jnp.array([0, 4, 13], dtype=jnp.int32)
    N2, D2 = 20, 256
    feats2 = jax.random.normal(jax.random.PRNGKey(1), (N2, D2), dtype=jnp.float32)

    out2 = jax.block_until_ready(
        global_average_block(feats2, offsets2, counts2, tile_n=8))
    ref2 = jnp.stack([
        feats2[0:4].mean(axis=0),
        feats2[4:13].mean(axis=0),
        feats2[13:20].mean(axis=0),
    ])
    assert out2.shape == (3, D2)
    assert jnp.allclose(out2, ref2, atol=1e-5, rtol=1e-5)

    print("KERNEL_OK")
</pallas_src>

<mosaic_0001>
module attributes {stable_mosaic.version = 11 : i64} {
  func.func @_seg_mean_kernel(%arg0: i32, %arg1: i32, %arg2: memref<2x1xi32, #tpu.memory_space<vmem>>, %arg3: memref<2x1xi32, #tpu.memory_space<vmem>>, %arg4: memref<2x1xf32, #tpu.memory_space<vmem>>, %arg5: memref<12x32xf32, #tpu.memory_space<vmem>>, %arg6: memref<2x32xf32, #tpu.memory_space<vmem>>, %arg7: memref<2x32xf32, #tpu.memory_space<vmem>>) attributes {dimension_semantics = [#tpu.dimension_semantics<parallel>, #tpu.dimension_semantics<arbitrary>], iteration_bounds = array<i64: 1, 1>, scalar_prefetch = 0 : i64, scratch_operands = 1 : i64, tpu.core_type = #tpu.core_type<tc>, window_params = [{pipeline_mode = #tpu.pipeline_mode<synchronous>, transform_indices = @transform_0, window_bounds = array<i64: 2, 1>}, {pipeline_mode = #tpu.pipeline_mode<synchronous>, transform_indices = @transform_1, window_bounds = array<i64: 2, 1>}, {pipeline_mode = #tpu.pipeline_mode<synchronous>, transform_indices = @transform_2, window_bounds = array<i64: 2, 1>}, {transform_indices = @transform_3, window_bounds = array<i64: 12, 32>}, {transform_indices = @transform_4, window_bounds = array<i64: 2, 32>}]} {
    %c0_i32 = arith.constant 0 : i32
    %0 = arith.cmpi eq, %arg1, %c0_i32 : i32
    %1 = arith.extui %0 : i1 to i32
    %c0_i32_0 = arith.constant 0 : i32
    %2 = arith.cmpi ne, %1, %c0_i32_0 : i32
    scf.if %2 {
      %cst_12 = arith.constant 0.000000e+00 : f32
      %26 = vector.broadcast %cst_12 : f32 to vector<2x32xf32>
      %c0_13 = arith.constant 0 : index
      %c0_14 = arith.constant 0 : index
      %27 = vector.load %arg7[%c0_13, %c0_14] : memref<2x32xf32, #tpu.memory_space<vmem>>, vector<2x32xf32>
      tpu.vector_store %arg7[%c0_13, %c0_14], %26 {strides = array<i32>} : memref<2x32xf32, #tpu.memory_space<vmem>>, vector<2x32xf32>,
    } else {
    }
    %c0 = arith.constant 0 : index
    %c0_1 = arith.constant 0 : index
    %3 = vector.load %arg5[%c0, %c0_1] : memref<12x32xf32, #tpu.memory_space<vmem>>, vector<12x32xf32>
    %4 = tpu.iota {dimensions = array<i32: 1>} : vector<2x12xi32>
    %c12_i32 = arith.constant 12 : i32
    %5 = arith.muli %arg1, %c12_i32 : i32
    %c0_2 = arith.constant 0 : index
    %c0_3 = arith.constant 0 : index
    %6 = vector.load %arg2[%c0_2, %c0_3] : memref<2x1xi32, #tpu.memory_space<vmem>>, vector<2x1xi32>
    %7 = vector.broadcast %5 : i32 to vector<2x1xi32>
    %8 = arith.subi %6, %7 : vector<2x1xi32>
    %c0_4 = arith.constant 0 : index
    %c0_5 = arith.constant 0 : index
    %9 = vector.load %arg3[%c0_4, %c0_5] : memref<2x1xi32, #tpu.memory_space<vmem>>, vector<2x1xi32>
    %10 = vector.broadcast %5 : i32 to vector<2x1xi32>
    %11 = arith.subi %9, %10 : vector<2x1xi32>
    %12 = vector.broadcast %8 : vector<2x1xi32> to vector<2x12xi32>
    %13 = arith.cmpi sge, %4, %12 : vector<2x12xi32>
    %14 = vector.broadcast %11 : vector<2x1xi32> to vector<2x12xi32>
    %15 = arith.cmpi slt, %4, %14 : vector<2x12xi32>
    %16 = arith.andi %13, %15 : vector<2x12xi1>
    %17 = arith.extui %16 : vector<2x12xi1> to vector<2x12xi32>
    %18 = arith.sitofp %17 : vector<2x12xi32> to vector<2x12xf32>
    %c0_6 = arith.constant 0 : index
    %c0_7 = arith.constant 0 : index
    %19 = vector.load %arg7[%c0_6, %c0_7] : memref<2x32xf32, #tpu.memory_space<vmem>>, vector<2x32xf32>
    %cst = arith.constant dense<0.000000e+00> : vector<2x32xf32>
    %20 = tpu.matmul %18, %3, %cst {dimension_numbers = #tpu.dot_dimension_numbers<[1], [0], [0], [1], [0, 0, 1, 1], [], []>} : vector<2x12xf32>, vector<12x32xf32>, vector<2x32xf32> -> vector<2x32xf32>
    %21 = arith.addf %19, %20 : vector<2x32xf32>
    %c0_8 = arith.constant 0 : index
    %c0_9 = arith.constant 0 : index
    %22 = vector.load %arg7[%c0_8, %c0_9] : memref<2x32xf32, #tpu.memory_space<vmem>>, vector<2x32xf32>
    tpu.vector_store %arg7[%c0_8, %c0_9], %21 {strides = array<i32>} : memref<2x32xf32, #tpu.memory_space<vmem>>, vector<2x32xf32>,
    %c0_i32_10 = arith.constant 0 : i32
    %23 = arith.cmpi eq, %arg1, %c0_i32_10 : i32
    %24 = arith.extui %23 : i1 to i32
    %c0_i32_11 = arith.constant 0 : i32
    %25 = arith.cmpi ne, %24, %c0_i32_11 : i32
    scf.if %25 {
      %c0_12 = arith.constant 0 : index
      %c0_13 = arith.constant 0 : index
      %26 = vector.load %arg7[%c0_12, %c0_13] : memref<2x32xf32, #tpu.memory_space<vmem>>, vector<2x32xf32>
      %c0_14 = arith.constant 0 : index
      %c0_15 = arith.constant 0 : index
      %27 = vector.load %arg4[%c0_14, %c0_15] : memref<2x1xf32, #tpu.memory_space<vmem>>, vector<2x1xf32>
      %28 = vector.broadcast %27 : vector<2x1xf32> to vector<2x32xf32>
      %29 = arith.mulf %26, %28 : vector<2x32xf32>
      %c0_16 = arith.constant 0 : index
      %c0_17 = arith.constant 0 : index
      %30 = vector.load %arg6[%c0_16, %c0_17] : memref<2x32xf32, #tpu.memory_space<vmem>>, vector<2x32xf32>
      tpu.vector_store %arg6[%c0_16, %c0_17], %29 {strides = array<i32>} : memref<2x32xf32, #tpu.memory_space<vmem>>, vector<2x32xf32>,
    } else {
    }
    return
  }
  func.func @transform_0(%arg0: i32, %arg1: i32) -> (i32, i32) {
    %c0_i32 = arith.constant 0 : i32
    %c0_i32_0 = arith.constant 0 : i32
    %c0_i32_1 = arith.constant 0 : i32
    return %c0_i32, %c0_i32_0 : i32, i32
  }
  func.func @transform_1(%arg0: i32, %arg1: i32) -> (i32, i32) {
    %c0_i32 = arith.constant 0 : i32
    %c0_i32_0 = arith.constant 0 : i32
    %c0_i32_1 = arith.constant 0 : i32
    return %c0_i32, %c0_i32_0 : i32, i32
  }
  func.func @transform_2(%arg0: i32, %arg1: i32) -> (i32, i32) {
    %c0_i32 = arith.constant 0 : i32
    %c0_i32_0 = arith.constant 0 : i32
    %c0_i32_1 = arith.constant 0 : i32
    return %c0_i32, %c0_i32_0 : i32, i32
  }
  func.func @transform_3(%arg0: i32, %arg1: i32) -> (i32, i32) {
    %c0_i32 = arith.constant 0 : i32
    return %arg1, %arg0 : i32, i32
  }
  func.func @transform_4(%arg0: i32, %arg1: i32) -> (i32, i32) {
    %c0_i32 = arith.constant 0 : i32
    %c0_i32_0 = arith.constant 0 : i32
    return %c0_i32, %arg0 : i32, i32
  }
}

</mosaic_0001>

<bundles_post_ra>
// kernel: tpu_custom_call.1
= control target key start
LH: loop header
LB: loop body
LE: loop exit
PB: predicated region body
PF: predicated region fallthrough
CT: control target
= control target key end

     0   :  { %v202_v1 = vmov 0   ;;  %s263_s0 = inlined_call_operand.vmem [shape: s32[2,1], index: 0, kind: input, shape index: {}]   ;;  %s264_s1 = inlined_call_operand.vmem [shape: s32[2,1], index: 1, kind: input, shape index: {}]   ;;  %s265_s2 = inlined_call_operand.vmem [shape: f32[2,1], index: 2, kind: input, shape index: {}]   ;;  %s266_s3 = inlined_call_operand.vmem [shape: f32[12,32], index: 3, kind: input, shape index: {}]   ;;  %s267_s4 = inlined_call_operand.hbm [shape: f32[2,32], index: 4, kind: output, shape index: {}]  }
   0x1   :  { %v29_v0 = vld [vmem:[%s263_s0] sm:$0x3]  ;;  %176 = vset.pattern.permute.xlu0 %v202_v1  ;;  %177 = vset.pattern.permute.xlu1 %v202_v1 }
   0x2   :  { %9 = vsyncpa [#allocation4], 0  ;;  %35 = vperm.xlu0 %176, %v29_v0   ;;  %v32_v2 = vld [vmem:[%s264_s1] sm:$0x3]  ;;  %v203_v3 = vmov 0.0|0.0   ;;  %vm50_vm0 = vcmask 1043456   ;;  %v26_v9 = vlaneseq }
   0x3   :  { %166 = vmatprep.subr.bf16.mxu0 %v203_v3  ;;  %v24_v4 = vld [vmem:[%s266_s3] sm:$0xff]  ;;  %v25_v5 = vld [vmem:[%s266_s3 + $0x8] sm:$0xf]  ;;  %vm204_vm1 = vmmov 1   ;;  %vm22_vm3 = vcmask 254976   ;;  %v205_v7 = vmov 0.0  }
   0x4   :  { %v167_v6 = vpack.c.bf16 %v25_v5, %v24_v4  ;;  %vm168_vm2 = vmpackc.low %vm50_vm0, %vm204_vm1  ;;  %23 = vst.msk [vmem:[#allocation2] sm:$0x3] %vm22_vm3, %v205_v7  ;;  %vm206_vm4 = vmmov 0   ;;  %v131_v8 = vld [vmem:[%s265_s2] sm:$0x3]  ;;  %v27_v11 = vand.u32 127, %v26_v9 }
   0x5   :  { %163 = vmatprep.mubr.msk.f32.mxu0 %vm206_vm4, %v205_v7  ;;  %134 = vperm.xlu1 %177, %v131_v8   ;;  %vm46_vm7 = vcmask 97280   ;;  %s207_s3 = smov [#allocation3]  }
   0x6   :  { %39 = vperm.xlu0 %176, %v32_v2   ;;  %169 = vmatpush3.bf16.msk.msra.mxu0 %vm168_vm2, %v167_v6  ;;  %s145_s2 = sshll.u32 %s207_s3, 4  ;;  %s146_s2 = int_to_ptr.vmem [resolvable:$true] %s145_s2 }
   0x7   :  { %s178_s23 = scalar_lea.vmem %s146_s2, 32  ;;  %p183_p1 = scmp.lt.s32.totalorder %s146_s2, %s146_s2 }
   0x8   :  { %p179_p0 = scmp.ne.s32.totalorder %s146_s2, %s178_s23  ;;  %p184_p2 = scmp.lt.s32.totalorder %s178_s23, %s178_s23 }
   0xa   :  { %p185_p3 = por %p184_p2, %p183_p1 }
   0xb   :  { %v45_v14 = vld [vmem:[#allocation2] sm:$0x3] }
   0xc   :  { %p186_p4 = pnand %p185_p3, %p179_p0 }
  0x81   :  { %v36_v10 = vpop.permute.xlu0 %35 }
  0x82   :  { %vm37_vm5 = vcmp.ge.s32.totalorder %v27_v11, %v36_v10 }
  0x84   :  { %v135_v18 = vpop.permute.xlu1 %134 }
  0x85   :  { %v40_v12 = vpop.permute.xlu0 %39 }
  0x86   :  { %vm41_vm6 = vcmp.lt.s32.totalorder %v27_v11, %v40_v12 }
  0x87   :  { %vm42_vm8 = vmand %vm37_vm5, %vm41_vm6 }
  0x88   :  { %v153_v13 = vsel %vm42_vm8, 1.0, %v205_v7 }
  0x89   :  { %164 = vmatmul.mubr.msk.f32.vlgmr.msra.gmra.mrb[0].mxu0 %vm46_vm7, %v153_v13 }
 0x15c   :  { %v120_v15 = vpop.f32.mrb[0].mxu0 }
 0x15d   :  { %v124_v16 = vadd.f32 %v120_v15, %v45_v14  ;;  %v165_v17 = vpop.f32.mrb[1].mxu0 }
 0x15f   :  { %126 = vst.msk [vmem:[#allocation2] sm:$0x3] %vm22_vm3, %v124_v16 }
 0x166   :  { %v130_v19 = vld [vmem:[#allocation2] sm:$0x3] }
 0x167   :  { %v137_v20 = vmul.f32 %v135_v18, %v130_v19 }
 0x169   :  { %138 = vst.msk [vmem:[#allocation3] sm:$0x3] %vm22_vm3, %v137_v20 }
 0x16a   :  { %189 = shalt.err (!%p186_p4)
}
 0x16b   :  { %s190_s26 = scalar_lea.hbm %s267_s4, 32 }
 0x16c   :  { %p191_p5 = scmp.ne.s32.totalorder %s267_s4, %s190_s26  ;;  %p194_p6 = scmp.lt.u32.totalorder %s190_s26, %s267_s4 }
 0x16e   :  { %p196_p7 = pnand %p194_p6, %p191_p5 }
 0x170   :  { %199 = shalt.err (!%p196_p7)
}
 0x171   :  { %148 = dma.vmem_to_hbm [thread:$0]  %s146_s2, 32, %s267_s4, [#allocation4]  }
 0x172   :  { %200 = dma.done.wait [#allocation4], 32  }
 0x173   :  { %201 = vsyncadd [#allocation4], 4294967264 }
 0x174   :  { %152 = vsyncpa [#allocation4], 1 }

</bundles_post_ra>
